<compile_context>
chip_gen: v7x
topology: tpu7x:2x2x1
jax: 0.10.0
libtpu: 0.0.40
codegen_flags: <defaults>
</compile_context>

<pallas_src>
import jax
import jax.numpy as jnp
from jax.experimental import pallas as pl
from jax.experimental.pallas import tpu as pltpu


def _channel_attention_kernel(x_ref, w1_ref, b1_ref, w2_ref, b2_ref, out_ref):
    # x_ref: (1, C, HW) in the input's native dtype. Params are f32.
    x = x_ref[0]                                   # (C, HW)
    hw = x.shape[-1]

    # Spatial (lane) reductions with f32 accumulation; keepdims keeps C on the
    # sublane dim so the final broadcast multiply needs no relayout.
    avg = jnp.sum(x, axis=-1, keepdims=True, dtype=jnp.float32) * (1.0 / hw)  # (C, 1)
    mx = jnp.max(x, axis=-1, keepdims=True).astype(jnp.float32)               # (C, 1)
    pooled = jnp.concatenate([avg, mx], axis=-1)   # (C, 2): fused avg/max operand

    w1 = w1_ref[...]                               # (hidden, C)
    b1 = b1_ref[...]                               # (hidden, 1)
    w2 = w2_ref[...]                               # (C, hidden)
    b2 = b2_ref[...]                               # (C, 1)

    # Shared MLP evaluated on both pooled vectors with a single pair of dots.
    h = jnp.dot(w1, pooled, preferred_element_type=jnp.float32) + b1   # (hidden, 2)
    h = jnp.maximum(h, 0.0)                                            # ReLU
    y2 = jnp.dot(w2, h, preferred_element_type=jnp.float32) + b2       # (C, 2)
    y = jnp.sum(y2, axis=-1, keepdims=True)        # mlp(avg) + mlp(max) -> (C, 1)
    scale = jax.nn.sigmoid(y)                      # (C, 1)

    out_ref[0] = x * scale.astype(x.dtype)         # broadcast over HW (lanes)


def channel_attention(x_nchw, w1, b1, w2, b2):
    """x_nchw: (B, C, H, W), any float dtype (preserved in the output).
    w1: (hidden, C), b1: (hidden,)  — first 1x1 conv (squeezed)
    w2: (C, hidden), b2: (C,)       — second 1x1 conv (squeezed)
    Returns (B, C, H, W) in x_nchw.dtype.
    """
    B, C, H, W = x_nchw.shape
    hidden = w1.shape[0]
    HW = H * W

    x = x_nchw.reshape(B, C, HW)                          # native dtype kept

    # Tiny parameters: keep f32 (negligible traffic), shaped for the kernel.
    w1f = w1.astype(jnp.float32)                          # (hidden, C)
    b1f = b1.reshape(hidden, 1).astype(jnp.float32)       # (hidden, 1)
    w2f = w2.astype(jnp.float32)                          # (C, hidden)
    b2f = b2.reshape(C, 1).astype(jnp.float32)            # (C, 1)

    # VMEM budget: x block + out block, double-buffered, + params + headroom.
    block_bytes = C * HW * jnp.dtype(x.dtype).itemsize
    param_bytes = 4 * (w1f.size + b1f.size + w2f.size + b2f.size)
    needed = 4 * block_bytes + 2 * param_bytes + (2 << 20)
    vmem_limit = int(min(max(needed, 16 << 20), 64 << 20))
    # TODO(synk): if 4*C*HW*itemsize exceeds ~64 MiB (v7x VMEM), switch to a
    # two-pass structure (HW-tiled pooled reduction, then a tiled scale pass).

    grid_spec = pltpu.PrefetchScalarGridSpec(
        num_scalar_prefetch=0,
        grid=(B,),
        in_specs=[
            pl.BlockSpec((1, C, HW), lambda b: (b, 0, 0)),   # x: per-batch block
            pl.BlockSpec((hidden, C), lambda b: (0, 0)),     # constant weight blocks
            pl.BlockSpec((hidden, 1), lambda b: (0, 0)),
            pl.BlockSpec((C, hidden), lambda b: (0, 0)),
            pl.BlockSpec((C, 1), lambda b: (0, 0)),
        ],
        out_specs=pl.BlockSpec((1, C, HW), lambda b: (b, 0, 0)),
    )

    out = pl.pallas_call(
        _channel_attention_kernel,
        out_shape=jax.ShapeDtypeStruct((B, C, HW), x.dtype),
        grid_spec=grid_spec,
        compiler_params=pltpu.CompilerParams(
            dimension_semantics=("parallel",),
            vmem_limit_bytes=vmem_limit,
        ),
    )(x, w1f, b1f, w2f, b2f)

    return out.reshape(B, C, H, W)


def channel_attention_ref(x, w1, b1, w2, b2):
    """Pure-JAX reference matching the PyTorch module semantics."""
    avg = jnp.mean(x.astype(jnp.float32), axis=(2, 3))   # (B, C)
    mx = jnp.max(x.astype(jnp.float32), axis=(2, 3))     # (B, C)

    def mlp(v):
        h = jnp.maximum(v @ w1.T + b1, 0.0)
        return h @ w2.T + b2

    scale = jax.nn.sigmoid(mlp(avg) + mlp(mx))            # (B, C)
    return (x * scale[:, :, None, None].astype(x.dtype)).astype(x.dtype)


if __name__ == "__main__":
    B, C, H, W = 2, 32, 16, 16
    ratio = 16
    hidden = C // ratio   # 2

    key = jax.random.PRNGKey(0)
    kx, kw1, kb1, kw2, kb2 = jax.random.split(key, 5)

    x = jax.random.normal(kx, (B, C, H, W), dtype=jnp.float32)
    # Conv2d(C, hidden, 1) weight is (hidden, C, 1, 1); we keep the squeezed form.
    w1 = jax.random.normal(kw1, (hidden, C), dtype=jnp.float32) * 0.1
    b1 = jax.random.normal(kb1, (hidden,), dtype=jnp.float32) * 0.1
    w2 = jax.random.normal(kw2, (C, hidden), dtype=jnp.float32) * 0.1
    b2 = jax.random.normal(kb2, (C,), dtype=jnp.float32) * 0.1

    out = channel_attention(x, w1, b1, w2, b2)
    out = jax.block_until_ready(out)

    ref = channel_attention_ref(x, w1, b1, w2, b2)
    assert out.shape == (B, C, H, W)
    assert out.dtype == x.dtype
    assert jnp.allclose(out, ref, atol=1e-5, rtol=1e-5), "mismatch vs reference"

    print("KERNEL_OK")
</pallas_src>

<mosaic_0001>
module attributes {stable_mosaic.version = 11 : i64} {
  func.func @_channel_attention_kernel(%arg0: i32, %arg1: memref<1x32x256xf32, #tpu.memory_space<vmem>>, %arg2: memref<2x32xf32, #tpu.memory_space<vmem>>, %arg3: memref<2x1xf32, #tpu.memory_space<vmem>>, %arg4: memref<32x2xf32, #tpu.memory_space<vmem>>, %arg5: memref<32x1xf32, #tpu.memory_space<vmem>>, %arg6: memref<1x32x256xf32, #tpu.memory_space<vmem>>) attributes {dimension_semantics = [#tpu.dimension_semantics<parallel>], iteration_bounds = array<i64: 2>, scalar_prefetch = 0 : i64, scratch_operands = 0 : i64, tpu.core_type = #tpu.core_type<tc>, window_params = [{transform_indices = @transform_0, window_bounds = array<i64: 1, 32, 256>}, {pipeline_mode = #tpu.pipeline_mode<synchronous>, transform_indices = @transform_1, window_bounds = array<i64: 2, 32>}, {pipeline_mode = #tpu.pipeline_mode<synchronous>, transform_indices = @transform_2, window_bounds = array<i64: 2, 1>}, {pipeline_mode = #tpu.pipeline_mode<synchronous>, transform_indices = @transform_3, window_bounds = array<i64: 32, 2>}, {pipeline_mode = #tpu.pipeline_mode<synchronous>, transform_indices = @transform_4, window_bounds = array<i64: 32, 1>}, {transform_indices = @transform_5, window_bounds = array<i64: 1, 32, 256>}]} {
    %c0 = arith.constant 0 : index
    %c0_0 = arith.constant 0 : index
    %c0_1 = arith.constant 0 : index
    %0 = vector.load %arg1[%c0, %c0_0, %c0_1] : memref<1x32x256xf32, #tpu.memory_space<vmem>>, vector<1x32x256xf32>
    %1 = vector.shape_cast %0 : vector<1x32x256xf32> to vector<32x256xf32>
    %cst = arith.constant dense<0.000000e+00> : vector<32xf32>
    %2 = vector.multi_reduction <add>, %1, %cst [1] : vector<32x256xf32> to vector<32xf32>
    %3 = vector.shape_cast %2 : vector<32xf32> to vector<32x1xf32>
    %cst_2 = arith.constant 3.906250e-03 : f32
    %4 = vector.broadcast %cst_2 : f32 to vector<32x1xf32>
    %5 = arith.mulf %3, %4 : vector<32x1xf32>
    %cst_3 = arith.constant dense<0xFF800000> : vector<32xf32>
    %6 = vector.multi_reduction <maximumf>, %1, %cst_3 [1] : vector<32x256xf32> to vector<32xf32>
    %7 = vector.shape_cast %6 : vector<32xf32> to vector<32x1xf32>
    %8 = tpu.concatenate %5, %7 in 1 : vector<32x1xf32>, vector<32x1xf32> -> vector<32x2xf32>
    %c0_4 = arith.constant 0 : index
    %c0_5 = arith.constant 0 : index
    %9 = vector.load %arg2[%c0_4, %c0_5] : memref<2x32xf32, #tpu.memory_space<vmem>>, vector<2x32xf32>
    %c0_6 = arith.constant 0 : index
    %c0_7 = arith.constant 0 : index
    %10 = vector.load %arg3[%c0_6, %c0_7] : memref<2x1xf32, #tpu.memory_space<vmem>>, vector<2x1xf32>
    %c0_8 = arith.constant 0 : index
    %c0_9 = arith.constant 0 : index
    %11 = vector.load %arg4[%c0_8, %c0_9] : memref<32x2xf32, #tpu.memory_space<vmem>>, vector<32x2xf32>
    %c0_10 = arith.constant 0 : index
    %c0_11 = arith.constant 0 : index
    %12 = vector.load %arg5[%c0_10, %c0_11] : memref<32x1xf32, #tpu.memory_space<vmem>>, vector<32x1xf32>
    %cst_12 = arith.constant dense<0.000000e+00> : vector<2x2xf32>
    %13 = tpu.matmul %9, %8, %cst_12 {dimension_numbers = #tpu.dot_dimension_numbers<[1], [0], [0], [1], [0, 0, 1, 1], [], []>} : vector<2x32xf32>, vector<32x2xf32>, vector<2x2xf32> -> vector<2x2xf32>
    %14 = vector.broadcast %10 : vector<2x1xf32> to vector<2x2xf32>
    %15 = arith.addf %13, %14 : vector<2x2xf32>
    %cst_13 = arith.constant 0.000000e+00 : f32
    %16 = vector.broadcast %cst_13 : f32 to vector<2x2xf32>
    %17 = arith.maximumf %15, %16 : vector<2x2xf32>
    %cst_14 = arith.constant dense<0.000000e+00> : vector<32x2xf32>
    %18 = tpu.matmul %11, %17, %cst_14 {dimension_numbers = #tpu.dot_dimension_numbers<[1], [0], [0], [1], [0, 0, 1, 1], [], []>} : vector<32x2xf32>, vector<2x2xf32>, vector<32x2xf32> -> vector<32x2xf32>
    %19 = vector.broadcast %12 : vector<32x1xf32> to vector<32x2xf32>
    %20 = arith.addf %18, %19 : vector<32x2xf32>
    %cst_15 = arith.constant dense<0.000000e+00> : vector<32xf32>
    %21 = vector.multi_reduction <add>, %20, %cst_15 [1] : vector<32x2xf32> to vector<32xf32>
    %22 = vector.shape_cast %21 : vector<32xf32> to vector<32x1xf32>
    %23 = arith.negf %22 : vector<32x1xf32>
    %24 = math.exp %23 : vector<32x1xf32>
    %cst_16 = arith.constant 1.000000e+00 : f32
    %25 = vector.broadcast %cst_16 : f32 to vector<32x1xf32>
    %26 = arith.addf %25, %24 : vector<32x1xf32>
    %27 = arith.divf %25, %26 : vector<32x1xf32>
    %28 = vector.broadcast %27 : vector<32x1xf32> to vector<32x256xf32>
    %29 = arith.mulf %1, %28 : vector<32x256xf32>
    %c0_17 = arith.constant 0 : index
    %c0_18 = arith.constant 0 : index
    %c0_19 = arith.constant 0 : index
    %30 = vector.load %arg6[%c0_17, %c0_18, %c0_19] : memref<1x32x256xf32, #tpu.memory_space<vmem>>, vector<1x32x256xf32>
    %31 = vector.shape_cast %30 : vector<1x32x256xf32> to vector<32x256xf32>
    %32 = vector.shape_cast %29 : vector<32x256xf32> to vector<1x32x256xf32>
    tpu.vector_store %arg6[%c0_17, %c0_18, %c0_19], %32 {strides = array<i32>} : memref<1x32x256xf32, #tpu.memory_space<vmem>>, vector<1x32x256xf32>,
    return
  }
  func.func @transform_0(%arg0: i32) -> (i32, i32, i32) {
    %c0_i32 = arith.constant 0 : i32
    %c0_i32_0 = arith.constant 0 : i32
    %c0_i32_1 = arith.constant 0 : i32
    return %arg0, %c0_i32, %c0_i32_0 : i32, i32, i32
  }
  func.func @transform_1(%arg0: i32) -> (i32, i32) {
    %c0_i32 = arith.constant 0 : i32
    %c0_i32_0 = arith.constant 0 : i32
    %c0_i32_1 = arith.constant 0 : i32
    return %c0_i32, %c0_i32_0 : i32, i32
  }
  func.func @transform_2(%arg0: i32) -> (i32, i32) {
    %c0_i32 = arith.constant 0 : i32
    %c0_i32_0 = arith.constant 0 : i32
    %c0_i32_1 = arith.constant 0 : i32
    return %c0_i32, %c0_i32_0 : i32, i32
  }
  func.func @transform_3(%arg0: i32) -> (i32, i32) {
    %c0_i32 = arith.constant 0 : i32
    %c0_i32_0 = arith.constant 0 : i32
    %c0_i32_1 = arith.constant 0 : i32
    return %c0_i32, %c0_i32_0 : i32, i32
  }
  func.func @transform_4(%arg0: i32) -> (i32, i32) {
    %c0_i32 = arith.constant 0 : i32
    %c0_i32_0 = arith.constant 0 : i32
    %c0_i32_1 = arith.constant 0 : i32
    return %c0_i32, %c0_i32_0 : i32, i32
  }
  func.func @transform_5(%arg0: i32) -> (i32, i32, i32) {
    %c0_i32 = arith.constant 0 : i32
    %c0_i32_0 = arith.constant 0 : i32
    %c0_i32_1 = arith.constant 0 : i32
    return %arg0, %c0_i32, %c0_i32_0 : i32, i32, i32
  }
}

</mosaic_0001>

<bundles_post_ra>
// kernel: tpu_custom_call.1
= control target key start
LH: loop header
LB: loop body
LE: loop exit
PB: predicated region body
PF: predicated region fallthrough
CT: control target
= control target key end

     0   :  { %10 = vsyncpa [#allocation3], 0  ;;  %s1150_s0 = inlined_call_operand.hbm [shape: f32[2,32,256], index: 0, kind: input, shape index: {}]   ;;  %s1151_s1 = inlined_call_operand.vmem [shape: f32[2,32], index: 1, kind: input, shape index: {}]   ;;  %s1152_s2 = inlined_call_operand.vmem [shape: f32[2,1], index: 2, kind: input, shape index: {}]   ;;  %s1153_s3 = inlined_call_operand.vmem [shape: f32[32,2], index: 3, kind: input, shape index: {}]   ;;  %s1154_s4 = inlined_call_operand.vmem [shape: f32[32,1], index: 4, kind: input, shape index: {}]   ;;  %s1155_s5 = inlined_call_operand.hbm [shape: f32[2,32,256], index: 5, kind: output, shape index: {}]  }
   0x1   :  { %12 = vsyncpa [#allocation3 + $0x1], 0 }
   0x2   :  { %13 = vsyncpa [#allocation4], 0 }
   0x3   :  { %15 = vsyncpa [#allocation4 + $0x1], 0  ;;  %s906_s18 = smov 0   ;;  %s908_s19 = smov 0  }
   0x4   :  { %s910_s20 = smov 0   ;;  %s912_s21 = smov 0  }
   0x5 LB: > { %s927_s22 = sadd.s32 4294967295, %s864_s21   ;;  %s635_s23 = sadd.s32 4294967294, %s864_s21   ;;  %s864_s21 = sphi %s912_s21, %s1168_s21   ;;  %s860_s20 = sphi %s910_s20, %s1167_s20   ;;  %s856_s19 = sphi %s908_s19, %s1166_s19   ;;  %s852_s18 = sphi %s906_s18, %s1165_s18  }
   0x6   : > { %s931_s24 = sadd.s32 1, %s864_s21   ;;  %s28_s25 = sadd.s32 1, %s860_s20 }
   0x7   : > { %s25_s26 = ssub.s32 %s864_s21, %s931_s24  ;;  %p35_p0 = scmp.ne.s32.totalorder %s860_s20, %s856_s19 }
   0x8   : > { %p26_p1 = scmp.eq.s32.totalorder %s25_s26, 0  ;;  %p36_p2 = scmp.eq.s32.totalorder %s864_s21, 0 }
   0x9   : > { %p41_p3 = scmp.ne.s32.totalorder %s856_s19, %s852_s18  ;;  %p42_p4 = scmp.eq.s32.totalorder %s927_s22, 0 }
   0xa   : > { %s943_s27 = scalar_select %p26_p1, %s860_s20, %s28_s25  }
   0xb   : > { %p945_p5 = por %p36_p2, %p35_p0  ;;  %p949_p6 = por %p42_p4, %p41_p3 }
   0xc   : > { %p149_p7 = scmp.eq.s32.totalorder %s927_s22, 1  ;;  %p155_p8 = scmp.eq.s32.totalorder %s635_s23, 1 }
   0xd   : > { %p708_p10 = scmp.lt.s32.totalorder %s864_s21, 2  ;;  %s187_s7 = sand.u32 1, %s860_s20  }
   0xe   : > { %p956_p11 = por %p149_p7, %p35_p0  ;;  %p960_p12 = por %p155_p8, %p41_p3 }
   0xf   : > { %s659_s8 = sshll.u32 %s864_s21, 10  ;;  %s638_s9 = sshll.u32 %s187_s7, 6 }
  0x10   : > { %s1159_s30 = scalar_select %p956_p11, 1, 0 }
  0x11   : > { %s1160_s6 = scalar_select %p960_p12, 1, 0 }
  0x12   : > { %s969_s12 = scalar_lea.hbm %s1150_s0, %s659_s8  ;;  %s191_s13 = scalar_lea.vmem [#allocation2], %s638_s9 }
  0x13   : > { %s198_s14 = sshll.u32 %s191_s13, 4  ;;  %p973_p13 = pnand %p708_p10, %p945_p5  ;;  %s977_s14 = int_to_ptr.vmem [resolvable:$true] %s198_s14 }
  0x14   : > { %s979_s16 = scalar_lea.sflag [#allocation3], %s187_s7  ;;  %s768_s17 = scalar_lea.hbm %s969_s12, 1024 }
  0x15   : > { %p769_p0 = scmp.ne.s32.totalorder %s969_s12, %s768_s17  ;;  %p770_p1 = pneg %p973_p13 }
  0x16   : > { %s773_s26 = scalar_lea.hbm %s1150_s0, 2048  ;;  %p774_p4 = scmp.lt.u32.totalorder %s969_s12, %s1150_s0 }
  0x17   : > { %p771_p2 = pnand %p770_p1, %p769_p0  ;;  %p775_p5 = scmp.lt.u32.totalorder %s773_s26, %s768_s17 }
  0x18   : > { %p777_p8 = scmp.lt.u32.totalorder %s768_s17, %s969_s12 }
  0x19   : > { %p772_p3 = pneg %p771_p2  ;;  %p776_p7 = por %p775_p5, %p774_p4 }
  0x1b   : > { %p778_p10 = por %p777_p8, %p776_p7 }
  0x1d   : > { %p779_p9 = pnand %p778_p10, %p772_p3 }
  0x1f   : > { %782 = shalt.err (!%p779_p9)
}
  0x20   : > { %s783_s7 = scalar_lea.vmem %s977_s14, 1024  ;;  %s866_s9 = smov [#allocation2]  }
  0x21   : > { %p784_p0 = scmp.ne.s32.totalorder %s977_s14, %s783_s7  ;;  %s788_s10 = sshll.u32 %s866_s9, 4  ;;  %s789_s10 = int_to_ptr.vmem [resolvable:$false] %s788_s10 }
  0x22   : > { %s790_s11 = scalar_lea.vmem %s789_s10, 2048  ;;  %p791_p11 = scmp.lt.s32.totalorder %s977_s14, %s789_s10 }
  0x23   : > { %p786_p2 = pnand %p784_p0, %p770_p1  ;;  %p792_p4 = scmp.lt.s32.totalorder %s790_s11, %s783_s7 }
  0x25   : > { %p787_p12 = pneg %p786_p2  ;;  %p793_p5 = por %p792_p4, %p791_p11 }
  0x27   : > { %p794_p7 = pnand %p793_p5, %p787_p12 }
  0x29   : > { %797 = shalt.err (!%p794_p7)
}
  0x2a   : > { %s867_s13 = smov 256   ;;  %s868_s17 = smov 16  }
  0x2b   : > { %703 = dma.hbm_to_vmem [thread:$0]  (!%p973_p13), %s969_s12, 1024, %s977_s14, %s979_s16, %s867_s13, %s867_s13, %s868_s17  }
  0x2c   : > { %p641_p9 = scmp.ge.s32.totalorder %s864_s21, 1  ;;  %p206_p1 = scmp.lt.s32.totalorder %s864_s21, 3 }
  0x2e   : > { %p207_p3 = pnand %p641_p9, %p206_p1 }
  0x2f   : > { %s1010_s23 = sand.u32 (!%p207_p3), 1, %s856_s19  }
  0x30   : > { %210 = sbr.rel (%p207_p3) target bundleno = 846 (0x34e), region = 40  ;;  %s642_s25 = sshll.u32 (!%p207_p3), %s1010_s23, 6 }
  0x31   : > { %s213_s26 = scalar_lea.sflag (!%p207_p3), [#allocation3], %s1010_s23  ;;  %s216_s28 = scalar_lea.vmem (!%p207_p3), [#allocation2], %s642_s25 }
  0x37   : > { %843 = dma.done.wait (%p949_p6), %s213_s26, 1024  }
  0x38   : > { %845 = vsyncadd (%p949_p6), %s213_s26, 4294966272  ;;  %v1020_v0 = vld [vmem:[%s216_s28] sm:$0xff]  ;;  %v1022_v1 = vld [vmem:[%s216_s28 + $0x8] sm:$0xff]  ;;  %v869_v16 = vmov 0.0|0.0   ;;  %vm870_vm0 = vmmov 0   ;;  %v871_v17 = vmov 0.0  }
  0x39   : > { %v1024_v2 = vld [vmem:[%s216_s28 + $0x10] sm:$0xff]  ;;  %v267_v3 = vmax.f32 %v1020_v0, %v1022_v1  ;;  %v251_v4 = vadd.f32 %v1022_v1, %v1020_v0  ;;  %v1030_v5 = vld [vmem:[%s216_s28 + $0x18] sm:$0xff]  ;;  %v1040_v10 = vld [vmem:[%s216_s28 + $0x20] sm:$0xff]  ;;  %690 = vmatprep.subr.bf16.mxu0 %v869_v16  ;;  %679 = vmatprep.mubr.msk.f32.mxu0 %vm870_vm0, %v871_v17  ;;  %v872_v19 = vmov 0   ;;  %vm279_vm1 = vcmask 7168   ;;  %s242_s7 = scalar_lea.vmem [#allocation5], %s642_s25 }
  0x3a   : > { %v270_v6 = vmax.f32 %v1024_v2, %v1030_v5  ;;  %v254_v7 = vadd.f32 %v1030_v5, %v1024_v2  ;;  %v1036_v8 = vld [vmem:[%s216_s28 + $0x30] sm:$0xff]  ;;  %v1038_v9 = vld [vmem:[%s216_s28 + $0x38] sm:$0xff]  ;;  %v1042_v11 = vld [vmem:[%s216_s28 + $0x28] sm:$0xff]  ;;  %750 = vset.pattern.permute.xlu0 %v872_v19  ;;  %751 = vset.pattern.permute.xlu1 %v872_v19  ;;  %vm299_vm2 = vcmask 261120   ;;  %vm394_vm3 = vcmask 15360   ;;  %s660_s9 = sshll.u32 %s927_s22, 10 }
  0x3b   : > { %268 = vmax.xlane.f32.xlu1 %v267_v3  ;;  %252 = vadd.xlane.f32.xlu0 %v251_v4  ;;  %v260_v12 = vadd.f32 %v1038_v9, %v1036_v8  ;;  %v257_v13 = vadd.f32 %v1042_v11, %v1040_v10  ;;  %v276_v14 = vmax.f32 %v1036_v8, %v1038_v9  ;;  %v285_v18 = vld [vmem:[%s1152_s2] sm:$0x3]  ;;  %v291_v41 = vld [vmem:[%s1154_s4 + $0x8] sm:$0xff]  ;;  %v292_v42 = vld [vmem:[%s1154_s4 + $0x10] sm:$0xff]  ;;  %vm407_vm4 = vcmask 1041408   ;;  %s562_s10 = sshll.u32 %s242_s7, 4  ;;  %s1102_s25 = scalar_lea.hbm %s1155_s5, %s660_s9  ;;  %s1104_s10 = int_to_ptr.vmem [resolvable:$true] %s562_s10 }
  0x3c   : > { %v273_v15 = vmax.f32 %v1040_v10, %v1042_v11  ;;  %v284_v38 = vld [vmem:[%s1151_s1] sm:$0x3]  ;;  %v293_v43 = vld [vmem:[%s1154_s4 + $0x18] sm:$0xff]  ;;  %v287_v49 = vld [vmem:[%s1153_s3 + $0x8] sm:$0xff]  ;;  %s549_s22 = scalar_lea.sflag [#allocation4], %s1010_s23  ;;  %s798_s17 = scalar_lea.vmem %s1104_s10, 1024 }
  0x3d   : > { %v286_v39 = vld [vmem:[%s1153_s3] sm:$0xff]  ;;  %v288_v50 = vld [vmem:[%s1153_s3 + $0x10] sm:$0xff]  ;;  %v289_v51 = vld [vmem:[%s1153_s3 + $0x18] sm:$0xff]  ;;  %p799_p6 = scmp.ne.s32.totalorder %s1104_s10, %s798_s17  ;;  %p1162_p11 = scmp.ne.s32.totalorder %s1159_s30, 0 }
  0x3e   : > { %684 = vmatprep.mubr.msk.f32.mxu1 %vm394_vm3, %v286_v39  ;;  %v290_v40 = vld [vmem:[%s1154_s4] sm:$0xff]  ;;  %s873_s26 = smov [#allocation5]  }
  0x3f   : > { %271 = vmax.xlane.f32.xlu1 %v270_v6  ;;  %255 = vadd.xlane.f32.xlu0 %v254_v7  ;;  %p800_p12 = pnand %p799_p6, %p1162_p11  ;;  %s802_s28 = sshll.u32 %s873_s26, 4  ;;  %s803_s28 = int_to_ptr.vmem [resolvable:$false] %s802_s28 }
  0x40   : > { %s804_s29 = scalar_lea.vmem %s803_s28, 2048  ;;  %p805_p8 = scmp.lt.s32.totalorder %s1104_s10, %s803_s28 }
  0x41   : > { %p801_p13 = pneg %p800_p12  ;;  %p806_p10 = scmp.lt.s32.totalorder %s804_s29, %s798_s17 }
  0x43   : > { %261 = vadd.xlane.f32.xlu1 %v260_v12  ;;  %258 = vadd.xlane.f32.xlu0 %v257_v13  ;;  %p807_p0 = por %p806_p10, %p805_p8 }
  0x45   : > { %p808_p2 = pnand %p807_p0, %p801_p13 }
  0x47   : > { %277 = vmax.xlane.f32.xlu1 %v276_v14  ;;  %274 = vmax.xlane.f32.xlu0 %v273_v15 }
  0x58   : > { %376 = vperm.xlu1 %751, %v290_v40  }
  0x5c   : > { %381 = vperm.xlu1 %751, %v291_v41  }
  0x5d   : > { %296 = vperm.xlu0 %750, %v285_v18  }
  0x60   : > { %386 = vperm.xlu1 %751, %v292_v42  }
  0x64   : > { %391 = vperm.xlu1 %751, %v293_v43  }
  0xc8   : > { %v269_v20 = vpop.xlane.xlu1 %268  ;;  %v253_v21 = vpop.xlane.xlu0 %252 }
  0xc9   : > { %v263_v22 = vmul.f32 0.00390625, %v253_v21 }
  0xcb   : > { %v280_v26 = vsel %vm279_vm1, %v263_v22, %v269_v20 }
  0xcc   : > { %v272_v23 = vpop.xlane.xlu1 %271  ;;  %v256_v24 = vpop.xlane.xlu0 %255 }
  0xcd   : > { %v264_v25 = vmul.f32 0.00390625, %v256_v24 }
  0xcf   : > { %v281_v27 = vsel %vm279_vm1, %v264_v25, %v272_v23 }
  0xd0   : > { %v262_v28 = vpop.xlane.xlu1 %261  ;;  %v259_v29 = vpop.xlane.xlu0 %258  ;;  %v691_v30 = vpack.c.bf16 %v281_v27, %v280_v26 }
  0xd1   : > { %v266_v31 = vmul.f32 0.00390625, %v262_v28  ;;  %v265_v32 = vmul.f32 0.00390625, %v259_v29 }
  0xd2   : > { %692 = vmatpush3.bf16.msra.mxu0 %v691_v30 }
  0xd3   : > { %693 = vmatprep.subr.bf16.mxu0 %v869_v16 }
  0xd4   : > { %v278_v33 = vpop.xlane.xlu1 %277  ;;  %v275_v34 = vpop.xlane.xlu0 %274 }
  0xd5   : > { %v283_v35 = vsel %vm279_vm1, %v266_v31, %v278_v33  ;;  %v282_v36 = vsel %vm279_vm1, %v265_v32, %v275_v34 }
  0xd6   : > { %v694_v37 = vpack.c.bf16 %v283_v35, %v282_v36 }
  0xd8   : > { %695 = vmatpush3.bf16.msra.mxu0 %v694_v37  ;;  %v377_v52 = vpop.permute.xlu1 %376 }
  0xdb   : > { %680 = vmatmul.mubr.msk.f32.vlgmr.msra.gmra.mrb[0].mxu0 %vm299_vm2, %v284_v38 }
  0xdc   : > { %v297_v44 = vpop.permute.xlu0 %296  ;;  %v382_v53 = vpop.permute.xlu1 %381 }
  0xe0   : > { %v387_v55 = vpop.permute.xlu1 %386 }
  0xe4   : > { %v392_v3 = vpop.permute.xlu1 %391 }
 0x1ae   : > { %v369_v45 = vpop.f32.mrb[0].mxu0 }
 0x1af   : > { %v370_v46 = vadd.f32 %v369_v45, %v297_v44  ;;  %v681_v47 = vpop.f32.mrb[1].mxu0 }
 0x1b1   : > { %v373_v48 = vmax.f32 %v370_v46, 0.0 }
 0x1b3   : > { %682 = vmatprep.subr.msk.mxu1 %vm407_vm4, %v373_v48 }
 0x1b4   : > { %683 = vmatpush3.msk.msra.mxu1 %vm407_vm4, %v373_v48 }
 0x1b5   : > { %685 = vmatmul.mubr.msk.f32.vlgmr.msra.gmra.mrb[0].mxu1 %vm394_vm3, %v287_v49 }
 0x1b6   : > { %687 = vmatprep.mubr.msk.f32.mxu1 %vm394_vm3, %v288_v50 }
 0x1b9   : > { %688 = vmatmul.mubr.msk.f32.gmra.mrb[2].mxu1 %vm394_vm3, %v289_v51 }
 0x288   : > { %v686_v54 = vpop.f32.mrb[0].mxu1 }
 0x289   : > { %v483_v56 = vadd.f32 %v686_v54, %v382_v53  ;;  %v477_v57 = vpop.f32.mrb[1].mxu1 }
 0x28a   : > { %v478_v58 = vadd.f32 %v477_v57, %v377_v52 }
 0x28b   : > { %v499_v59 = vsel %vm394_vm3, %v483_v56, 0.0 }
 0x28c   : > { %500 = vadd.xlane.f32.xlu0 %v499_v59  ;;  %v689_v60 = vpop.f32.mrb[2].mxu1  ;;  %v496_v61 = vsel %vm394_vm3, %v478_v58, 0.0 }
 0x28d   : > { %v487_v62 = vpop.f32.mrb[3].mxu1  ;;  %497 = vadd.xlane.f32.xlu1 %v496_v61  ;;  %v493_v4 = vadd.f32 %v689_v60, %v392_v3 }
 0x28e   : > { %v488_v63 = vadd.f32 %v487_v62, %v387_v55 }
 0x28f   : > { %v505_v7 = vsel %vm394_vm3, %v493_v4, 0.0 }
 0x290   : > { %v502_v6 = vsel %vm394_vm3, %v488_v63, 0.0 }
 0x291   : > { %503 = vadd.xlane.f32.xlu1 %v502_v6 }
 0x295   : > { %506 = vadd.xlane.f32.xlu1 %v505_v7 }
 0x319   : > { %v501_v12 = vpop.xlane.xlu0 %500 }
 0x31a   : > { %v651_v13 = vmul.f32 -1.442695, %v501_v12  ;;  %v498_v14 = vpop.xlane.xlu1 %497 }
 0x31b   : > { %v650_v15 = vmul.f32 -1.442695, %v498_v14 }
 0x31c   : > { %752 = vpow2.f32 %v651_v13 }
 0x31d   : > { %754 = vpow2.f32 %v650_v15 }
 0x31e   : > { %v504_v16 = vpop.xlane.xlu1 %503 }
 0x31f   : > { %v652_v17 = vmul.f32 -1.442695, %v504_v16 }
 0x321   : > { %756 = vpow2.f32 %v652_v17 }
 0x322   : > { %v507_v18 = vpop.xlane.xlu1 %506 }
 0x323   : > { %v653_v19 = vmul.f32 -1.442695, %v507_v18 }
 0x325   : > { %758 = vpow2.f32 %v653_v19 }
 0x326   : > { %v753_v20 = vpop.eup %752 }
 0x327   : > { %v755_v21 = vpop.eup %754  ;;  %v521_v22 = vadd.f32 1.0, %v753_v20 }
 0x328   : > { %v520_v23 = vadd.f32 1.0, %v755_v21 }
 0x329   : > { %760 = vrcp.f32 %v521_v22 }
 0x32a   : > { %762 = vrcp.f32 %v520_v23 }
 0x32b   : > { %v757_v24 = vpop.eup %756 }
 0x32c   : > { %v522_v25 = vadd.f32 1.0, %v757_v24 }
 0x32e   : > { %764 = vrcp.f32 %v522_v25 }
 0x32f   : > { %v759_v26 = vpop.eup %758 }
 0x330   : > { %v523_v27 = vadd.f32 1.0, %v759_v26 }
 0x332   : > { %766 = vrcp.f32 %v523_v27 }
 0x333   : > { %v761_v28 = vpop.eup %760 }
 0x334   : > { %v763_v29 = vpop.eup %762  ;;  %v534_v30 = vmul.f32 %v761_v28, %v1024_v2  ;;  %v535_v31 = vmul.f32 %v761_v28, %v1030_v5 }
 0x335   : > { %v532_v32 = vmul.f32 %v763_v29, %v1020_v0  ;;  %v533_v33 = vmul.f32 %v763_v29, %v1022_v1 }
 0x336   : > { %542 = vst [vmem:[%s242_s7 + $0x10] sm:$0xff] %v534_v30  ;;  %543 = vst [vmem:[%s242_s7 + $0x18] sm:$0xff] %v535_v31 }
 0x337   : > { %540 = vst [vmem:[%s242_s7] sm:$0xff] %v532_v32  ;;  %541 = vst [vmem:[%s242_s7 + $0x8] sm:$0xff] %v533_v33 }
 0x338   : > { %v765_v34 = vpop.eup %764 }
 0x339   : > { %v536_v35 = vmul.f32 %v765_v34, %v1040_v10  ;;  %v537_v36 = vmul.f32 %v765_v34, %v1042_v11 }
 0x33b   : > { %544 = vst [vmem:[%s242_s7 + $0x20] sm:$0xff] %v536_v35  ;;  %545 = vst [vmem:[%s242_s7 + $0x28] sm:$0xff] %v537_v36 }
 0x33c   : > { %v767_v0 = vpop.eup %766 }
 0x33d   : > { %v538_v1 = vmul.f32 %v767_v0, %v1036_v8  ;;  %v539_v2 = vmul.f32 %v767_v0, %v1038_v9 }
 0x33f   : > { %546 = vst [vmem:[%s242_s7 + $0x30] sm:$0xff] %v538_v1  ;;  %547 = vst [vmem:[%s242_s7 + $0x38] sm:$0xff] %v539_v2 }
 0x340   : > { %811 = shalt.err (!%p808_p2)
}
 0x341   : > { %s812_s12 = scalar_lea.hbm %s1102_s25, 1024  ;;  %s816_s16 = scalar_lea.hbm %s1155_s5, 2048 }
 0x342   : > { %p813_p4 = scmp.ne.s32.totalorder %s1102_s25, %s812_s12  ;;  %p817_p9 = scmp.lt.u32.totalorder %s1102_s25, %s1155_s5 }
 0x343   : > { %p818_p1 = scmp.lt.u32.totalorder %s816_s16, %s812_s12  ;;  %p820_p6 = scmp.lt.u32.totalorder %s812_s12, %s1102_s25 }
 0x344   : > { %p814_p5 = pnand %p813_p4, %p1162_p11 }
 0x345   : > { %p819_p3 = por %p818_p1, %p817_p9 }
 0x346   : > { %p815_p7 = pneg %p814_p5 }
 0x347   : > { %p821_p12 = por %p820_p6, %p819_p3 }
 0x349   : > { %p822_p13 = pnand %p821_p12, %p815_p7 }
 0x34b   : > { %825 = shalt.err (!%p822_p13)
}
 0x34c   : > { %s874_s9 = smov 256   ;;  %s875_s11 = smov 16  }
 0x34d   : > { %698 = dma.vmem_to_hbm [thread:$0]  (%p1162_p11), %s1104_s10, 1024, %s1102_s25, %s549_s22, %s874_s9, %s874_s9, %s875_s11  }
 0x34e PF: > { %s577_s13 = sand.u32 1, %s852_s18   ;;  %p1163_p8 = scmp.ne.s32.totalorder %s1160_s6, 0 }
 0x34f   : > { %p1164_p10 = scmp.ge.s32.totalorder %s864_s21, 2  ;;  %s578_s17 = scalar_lea.sflag [#allocation4], %s577_s13 }
 0x351   : > { %p705_p0 = pnand %p1164_p10, %p1163_p8 }
 0x353   : > { %847 = dma.done.wait (!%p705_p0), %s578_s17, 1024  }
 0x354   : > { %849 = vsyncadd (!%p705_p0), %s578_s17, 4294966272  ;;  %p18_p2 = scmp.ge.s32.totalorder %s931_s24, 4   ;;  %s1165_s18 = smov %s856_s19 }
 0x355   : > { %s1166_s19 = smov %s860_s20  ;;  %s1167_s20 = smov %s943_s27 }
 0x356   : > { %s1168_s21 = smov %s931_s24  ;;  %20 = sbr.rel (!%p18_p2) target bundleno = 5 (0x5), region = 85 }
 0x35d   :  { %583 = vsyncpa [#allocation3], 1 }
 0x35e   :  { %585 = vsyncpa [#allocation3 + $0x1], 1 }
 0x35f   :  { %586 = vsyncpa [#allocation4], 1 }
 0x360   :  { %588 = vsyncpa [#allocation4 + $0x1], 1 }

</bundles_post_ra>
